<compile_context>
chip_gen: v5e
topology: v5e:2x2
jax: 0.10.0
libtpu: 0.0.40
codegen_flags: <defaults>
</compile_context>

<pallas_src>
import functools

import jax
import jax.numpy as jnp
from jax.experimental import pallas as pl
from jax.experimental.pallas import tpu as pltpu

LANE = 128   # lane width / MXU column granularity
SUB = 16     # bf16 sublane pack


def _make_cls_head_kernel(tanh_in_bf16):
    """out = out_proj(tanh(dense(x))) for one (TB, H) batch tile."""

    def kernel(x_ref, w1_ref, b1_ref, w2_ref, b2_ref, o_ref):
        # bf16 into the MXU, f32 accumulation.
        x = x_ref[...].astype(jnp.bfloat16)                                 # (TB, H)
        h = jnp.dot(x, w1_ref[...], preferred_element_type=jnp.float32)    # (TB, H) f32
        h = h + b1_ref[...]                                                 # bias add (f32 acc)

        # TODO(synk): dropout is identity in eval mode; training-mode dropout (prng + mask)
        # is intentionally not implemented here.

        if tanh_in_bf16:
            # v6e / v7x: EUP tanh is the binding slot -- run it packed in bf16.
            h2 = jnp.tanh(h.astype(jnp.bfloat16))                           # (TB, H) bf16
        else:
            # v5e: no bf16 VPU/EUP -- keep tanh in f32, cast only for the MXU.
            h2 = jnp.tanh(h).astype(jnp.bfloat16)

        out = jnp.dot(h2, w2_ref[...], preferred_element_type=jnp.float32)  # (TB, L_pad) f32
        o_ref[...] = (out + b2_ref[...]).astype(o_ref.dtype)

    return kernel


def prepare_head_params(w_dense, b_dense, w_out, b_out):
    """One-time parameter prep.  Call at model init, NOT per forward call.

    Returns bf16 (H, H) dense weight, bf16 (H, 128) lane-padded out_proj weight,
    f32 (1, H) / (1, 128) biases, plus the true label count.
    """
    H = w_dense.shape[0]
    L = w_out.shape[1]
    L_pad = max(LANE, ((L + LANE - 1) // LANE) * LANE)

    w1 = w_dense.astype(jnp.bfloat16)
    w2 = jnp.zeros((H, L_pad), jnp.bfloat16).at[:, :L].set(w_out.astype(jnp.bfloat16))
    b1 = b_dense.reshape(1, H).astype(jnp.float32)
    b2 = jnp.zeros((1, L_pad), jnp.float32).at[:, :L].set(b_out.astype(jnp.float32))
    return {"w1": w1, "b1": b1, "w2": w2, "b2": b2, "num_labels": L}


def _tanh_bf16_default():
    """bf16 tanh on v6e/v7x; f32 tanh on v5-generation parts (no bf16 VPU/EUP)."""
    try:
        kind = jax.devices()[0].device_kind.lower()
        return "v5" not in kind
    except Exception:
        return False


def roberta_classification_head(features, params, *, block_b=512, tanh_in_bf16=None):
    """features: (B, S, H).  params: output of prepare_head_params.  Returns (B, num_labels) f32."""
    B, S, H = features.shape
    w1, b1, w2, b2 = params["w1"], params["b1"], params["w2"], params["b2"]
    L = params["num_labels"]
    L_pad = w2.shape[1]

    if tanh_in_bf16 is None:
        tanh_in_bf16 = _tanh_bf16_default()

    # Batch tile: split into at least 2 tiles (when B > one sublane pack) so the "parallel"
    # grid axis can shard across v7x's two TensorCores; keep tiles large (cap block_b) so
    # single-TC parts stay near the HBM roofline with few grid steps.
    if B <= SUB:
        TB = B
    else:
        half = -(-B // 2)                # ceil(B / 2)
        half = -(-half // SUB) * SUB     # round up to the bf16 sublane pack
        TB = min(block_b, half)
    grid_b = pl.cdiv(B, TB)              # tail block (if any) is masked on writeback

    # Fuse the [CLS] gather into the kernel's pipelined DMA: a free row-major reshape lets a
    # (TB, H) block at column-block 0 select exactly features[:, 0, :] (only B*H bytes DMA'd).
    if H % LANE == 0:
        x_src = features.reshape(B, S * H)
    else:
        x_src = features[:, 0, :]

    itemsize = jnp.dtype(features.dtype).itemsize
    cost = pl.CostEstimate(
        flops=2 * B * H * H + 2 * B * H * L_pad,
        transcendentals=B * H,
        bytes_accessed=(B * H * itemsize            # CLS activations actually DMA'd
                        + 2 * H * H + 2 * H * L_pad  # bf16 weights
                        + 4 * (H + L_pad)            # f32 biases
                        + 4 * B * L_pad),            # f32 output
    )

    # Constant-index weights/biases: single-buffered (no re-DMA happens, save the VMEM).
    resident = functools.partial(pl.BlockSpec, pipeline_mode=pl.Buffered(1))

    out = pl.pallas_call(
        _make_cls_head_kernel(tanh_in_bf16),
        out_shape=jax.ShapeDtypeStruct((B, L_pad), jnp.float32),
        grid=(grid_b,),
        in_specs=[
            pl.BlockSpec((TB, H), lambda i: (i, 0)),        # CLS rows, tiled over batch
            resident((H, H), lambda i: (0, 0)),             # dense weight (in, out), bf16
            resident((1, H), lambda i: (0, 0)),             # dense bias, f32
            resident((H, L_pad), lambda i: (0, 0)),         # out_proj weight, lane-padded, bf16
            resident((1, L_pad), lambda i: (0, 0)),         # out_proj bias, lane-padded, f32
        ],
        out_specs=pl.BlockSpec((TB, L_pad), lambda i: (i, 0)),
        compiler_params=pltpu.CompilerParams(
            dimension_semantics=("parallel",)),             # batch axis shards across TCs on v7x
        cost_estimate=cost,
    )(x_src, w1, b1, w2, b2)

    # Padded columns are exactly zero (zero-padded W2/b2); slice them off outside the kernel.
    return out[:, :L]


def reference_head(features, w_dense, b_dense, w_out, b_out):
    x = features[:, 0, :]
    x = jnp.tanh(x @ w_dense + b_dense)
    return x @ w_out + b_out


if __name__ == "__main__":
    # Small config exercising batch tiling + lane-aligned hidden (fused CLS gather path):
    # batch=32, seq=8, hidden=128, num_labels=4.  B=32 -> TB=16, grid=2 (two batch tiles).
    B, S, H, L = 32, 8, 128, 4

    key = jax.random.PRNGKey(0)
    k_feat, k_w1, k_b1, k_w2, k_b2 = jax.random.split(key, 5)

    features = jax.random.normal(k_feat, (B, S, H), dtype=jnp.float32)

    # Deterministic synthetic parameters; stored as (in_features, out_features).
    w_dense = jax.random.normal(k_w1, (H, H), dtype=jnp.float32) * 0.02
    b_dense = jax.random.normal(k_b1, (H,), dtype=jnp.float32) * 0.02
    w_out = jax.random.normal(k_w2, (H, L), dtype=jnp.float32) * 0.02
    b_out = jax.random.normal(k_b2, (L,), dtype=jnp.float32) * 0.02

    # One-time weight prep (would live at model init in a real model).
    params = prepare_head_params(w_dense, b_dense, w_out, b_out)

    # Per-call forward: only the Pallas kernel + a tiny output slice.
    fwd = jax.jit(lambda f: roberta_classification_head(f, params))

    logits = jax.block_until_ready(fwd(features))

    ref = reference_head(features, w_dense, b_dense, w_out, b_out)
    assert logits.shape == (B, L)
    # bf16 MXU inputs (and bf16 tanh on v6e/v7x) with f32 accumulation -> compare against the
    # f32 reference with a tolerance sized for bf16 rounding at these magnitudes.
    assert jnp.allclose(logits, ref, atol=1e-2, rtol=1e-2), (
        float(jnp.max(jnp.abs(logits - ref))))

    print("KERNEL_OK")
</pallas_src>

<mosaic_0001>
module attributes {stable_mosaic.version = 11 : i64} {
  func.func @kernel(%arg0: i32, %arg1: memref<16x128xf32, #tpu.memory_space<vmem>>, %arg2: memref<128x128xbf16, #tpu.memory_space<vmem>>, %arg3: memref<1x128xf32, #tpu.memory_space<vmem>>, %arg4: memref<128x128xbf16, #tpu.memory_space<vmem>>, %arg5: memref<1x128xf32, #tpu.memory_space<vmem>>, %arg6: memref<16x128xf32, #tpu.memory_space<vmem>>) attributes {dimension_semantics = [#tpu.dimension_semantics<parallel>], iteration_bounds = array<i64: 2>, scalar_prefetch = 0 : i64, scratch_operands = 0 : i64, tpu.core_type = #tpu.core_type<tc>, window_params = [{transform_indices = @transform_0, window_bounds = array<i64: 16, 128>}, {pipeline_mode = #tpu.pipeline_mode<synchronous>, transform_indices = @transform_1, window_bounds = array<i64: 128, 128>}, {pipeline_mode = #tpu.pipeline_mode<synchronous>, transform_indices = @transform_2, window_bounds = array<i64: 1, 128>}, {pipeline_mode = #tpu.pipeline_mode<synchronous>, transform_indices = @transform_3, window_bounds = array<i64: 128, 128>}, {pipeline_mode = #tpu.pipeline_mode<synchronous>, transform_indices = @transform_4, window_bounds = array<i64: 1, 128>}, {transform_indices = @transform_5, window_bounds = array<i64: 16, 128>}]} {
    %c0 = arith.constant 0 : index
    %c0_0 = arith.constant 0 : index
    %0 = vector.load %arg1[%c0, %c0_0] : memref<16x128xf32, #tpu.memory_space<vmem>>, vector<16x128xf32>
    %1 = arith.truncf %0 : vector<16x128xf32> to vector<16x128xbf16>
    %c0_1 = arith.constant 0 : index
    %c0_2 = arith.constant 0 : index
    %2 = vector.load %arg2[%c0_1, %c0_2] : memref<128x128xbf16, #tpu.memory_space<vmem>>, vector<128x128xbf16>
    %cst = arith.constant dense<0.000000e+00> : vector<16x128xf32>
    %3 = tpu.matmul %1, %2, %cst {dimension_numbers = #tpu.dot_dimension_numbers<[1], [0], [0], [1], [0, 0, 1, 1], [], []>} : vector<16x128xbf16>, vector<128x128xbf16>, vector<16x128xf32> -> vector<16x128xf32>
    %c0_3 = arith.constant 0 : index
    %c0_4 = arith.constant 0 : index
    %4 = vector.load %arg3[%c0_3, %c0_4] : memref<1x128xf32, #tpu.memory_space<vmem>>, vector<1x128xf32>
    %5 = vector.broadcast %4 : vector<1x128xf32> to vector<16x128xf32>
    %6 = arith.addf %3, %5 : vector<16x128xf32>
    %7 = arith.truncf %6 : vector<16x128xf32> to vector<16x128xbf16>
    %8 = math.tanh %7 : vector<16x128xbf16>
    %c0_5 = arith.constant 0 : index
    %c0_6 = arith.constant 0 : index
    %9 = vector.load %arg4[%c0_5, %c0_6] : memref<128x128xbf16, #tpu.memory_space<vmem>>, vector<128x128xbf16>
    %cst_7 = arith.constant dense<0.000000e+00> : vector<16x128xf32>
    %10 = tpu.matmul %8, %9, %cst_7 {dimension_numbers = #tpu.dot_dimension_numbers<[1], [0], [0], [1], [0, 0, 1, 1], [], []>} : vector<16x128xbf16>, vector<128x128xbf16>, vector<16x128xf32> -> vector<16x128xf32>
    %c0_8 = arith.constant 0 : index
    %c0_9 = arith.constant 0 : index
    %11 = vector.load %arg5[%c0_8, %c0_9] : memref<1x128xf32, #tpu.memory_space<vmem>>, vector<1x128xf32>
    %12 = vector.broadcast %11 : vector<1x128xf32> to vector<16x128xf32>
    %13 = arith.addf %10, %12 : vector<16x128xf32>
    %c0_10 = arith.constant 0 : index
    %c0_11 = arith.constant 0 : index
    %14 = vector.load %arg6[%c0_10, %c0_11] : memref<16x128xf32, #tpu.memory_space<vmem>>, vector<16x128xf32>
    tpu.vector_store %arg6[%c0_10, %c0_11], %13 {strides = array<i32>} : memref<16x128xf32, #tpu.memory_space<vmem>>, vector<16x128xf32>,
    return
  }
  func.func @transform_0(%arg0: i32) -> (i32, i32) {
    %c0_i32 = arith.constant 0 : i32
    %c0_i32_0 = arith.constant 0 : i32
    return %arg0, %c0_i32 : i32, i32
  }
  func.func @transform_1(%arg0: i32) -> (i32, i32) {
    %c0_i32 = arith.constant 0 : i32
    %c0_i32_0 = arith.constant 0 : i32
    %c0_i32_1 = arith.constant 0 : i32
    return %c0_i32, %c0_i32_0 : i32, i32
  }
  func.func @transform_2(%arg0: i32) -> (i32, i32) {
    %c0_i32 = arith.constant 0 : i32
    %c0_i32_0 = arith.constant 0 : i32
    %c0_i32_1 = arith.constant 0 : i32
    return %c0_i32, %c0_i32_0 : i32, i32
  }
  func.func @transform_3(%arg0: i32) -> (i32, i32) {
    %c0_i32 = arith.constant 0 : i32
    %c0_i32_0 = arith.constant 0 : i32
    %c0_i32_1 = arith.constant 0 : i32
    return %c0_i32, %c0_i32_0 : i32, i32
  }
  func.func @transform_4(%arg0: i32) -> (i32, i32) {
    %c0_i32 = arith.constant 0 : i32
    %c0_i32_0 = arith.constant 0 : i32
    %c0_i32_1 = arith.constant 0 : i32
    return %c0_i32, %c0_i32_0 : i32, i32
  }
  func.func @transform_5(%arg0: i32) -> (i32, i32) {
    %c0_i32 = arith.constant 0 : i32
    %c0_i32_0 = arith.constant 0 : i32
    return %arg0, %c0_i32 : i32, i32
  }
}

</mosaic_0001>

<bundles_post_ra>
// kernel: _lambda_.1
= control target key start
LH: loop header
LB: loop body
LE: loop exit
PB: predicated region body
PF: predicated region fallthrough
CT: control target
= control target key end

     0   :  { %s685_s18 = smov 0   ;;  %s687_s19 = smov 0   ;;  %s791_s0 = inlined_call_operand.vmem [shape: f32[32,1024], index: 0, kind: input, shape index: {}]   ;;  %s792_s1 = inlined_call_operand.vmem [shape: bf16[128,128], index: 1, kind: input, shape index: {}]   ;;  %s793_s2 = inlined_call_operand.vmem [shape: f32[1,128], index: 2, kind: input, shape index: {}]   ;;  %s794_s3 = inlined_call_operand.vmem [shape: bf16[128,128], index: 3, kind: input, shape index: {}]   ;;  %s795_s4 = inlined_call_operand.vmem [shape: f32[1,128], index: 4, kind: input, shape index: {}]   ;;  %s796_s5 = inlined_call_operand.vmem [shape: f32[32,128], index: 5, kind: output, shape index: {}]  }
   0x1   :  { %s689_s20 = smov 0  }
   0x2 LB: > { %s505_s21 = sadd.s32 4294967295, %s653_s20   ;;  %s702_s22 = sadd.s32 1, %s653_s20   ;;  %s653_s20 = sphi %s689_s20, %s799_s20   ;;  %s649_s19 = sphi %s687_s19, %s798_s19   ;;  %s645_s18 = sphi %s685_s18, %s797_s18  }
   0x3   : > { %s19_s23 = ssub.s32 %s653_s20, %s702_s22  ;;  %s22_s24 = sadd.s32 1, %s649_s19 }
   0x4   : > { %p20_p0 = scmp.eq.s32.totalorder %s19_s23, 0  ;;  %p29_p1 = scmp.ne.s32.totalorder %s649_s19, %s645_s18 }
   0x5   : > { %p30_p2 = scmp.eq.s32.totalorder %s653_s20, 0  ;;  %p508_p4 = scmp.ge.s32.totalorder %s653_s20, 2 }
   0x6   : > { %s711_s25 = scalar_select %p20_p0, %s649_s19, %s22_s24  }
   0x7   : > { %p31_p3 = por %p30_p2, %p29_p1  ;;  %177 = sbr.rel (%p508_p4) target bundleno = 18 (0x12), region = 32 }
   0xc   : > { %180 = sbr.rel (!%p31_p3) target bundleno = 18 (0x12), region = 36  ;;  %s182_s26 = sand.u32 (%p31_p3), 1, %s649_s19  }
   0xd   : > { %s584_s27 = sshll.u32 (%p31_p3), %s653_s20, 7  ;;  %s509_s28 = sshll.u32 (%p31_p3), %s182_s26, 4 }
   0xe   : > { %s188_s6 = scalar_lea.vmem (%p31_p3), %s791_s0, %s584_s27  ;;  %s184_s7 = scalar_lea.vmem (%p31_p3), [#allocation2], %s509_s28 }
   0xf   : > { %v219_v0 = vld [vmem:[%s188_s6] sm:$0xff] (%p31_p3) }
  0x10   : > { %v221_v1 = vld [vmem:[%s188_s6 + $0x40] sm:$0xff] (%p31_p3)  ;;  %220 = vst [vmem:[%s184_s7] sm:$0xff] (%p31_p3), %v219_v0 }
  0x11   : > { %222 = vst [vmem:[%s184_s7 + $0x8] sm:$0xff] %v221_v1 }
  0x12 PF: > { %p513_p5 = scmp.ge.s32.totalorder %s653_s20, 1  ;;  %p227_p6 = scmp.lt.s32.totalorder %s653_s20, 3 }
  0x14   : > { %p228_p7 = pnand %p513_p5, %p227_p6 }
  0x15   : > { %s234_s28 = sand.u32 (!%p228_p7), 1, %s645_s18  }
  0x16   : > { %231 = sbr.rel (%p228_p7) target bundleno = 346 (0x15a), region = 74  ;;  %s514_s6 = sshll.u32 (!%p228_p7), %s234_s28, 4 }
  0x17   : > { %s236_s11 = scalar_lea.vmem (!%p228_p7), [#allocation2], %s514_s6  ;;  %s515_s6 = sshll.u32 (!%p228_p7), %s505_s21, 1 }
  0x18   : > { %p263_p8 = scmp.lt.s32.totalorder (!%p228_p7), %s515_s6, 3 }
  0x1b   : > { %v592_v2 = vld [vmem:[%s792_s1 + $0x38] sm:$0xff]  ;;  %v591_v3 = vld [vmem:[%s792_s1 + $0x30] sm:$0xff]  ;;  %v590_v6 = vld [vmem:[%s792_s1 + $0x28] sm:$0xff]  ;;  %s801_s6 = smov (!%p263_p8, %s515_s6), 3 }
  0x1c   : > { %339 = vmatpush.bf16.msra.mxu0 %v592_v2  ;;  %v600_v4 = vld [vmem:[%s794_s3 + $0x38] sm:$0xff]  ;;  %v599_v5 = vld [vmem:[%s794_s3 + $0x30] sm:$0xff]  ;;  %v589_v7 = vld [vmem:[%s792_s1 + $0x20] sm:$0xff]  ;;  %s516_s7 = sshll.u32 %s801_s6, 3 }
  0x1d   : > { %427 = vmatpush.bf16.msra.mxu1 %v600_v4  ;;  %v588_v8 = vld [vmem:[%s792_s1 + $0x18] sm:$0xff]  ;;  %v587_v9 = vld [vmem:[%s792_s1 + $0x10] sm:$0xff]  ;;  %v586_v10 = vld [vmem:[%s792_s1 + $0x8] sm:$0xff]  ;;  %s266_s18 = scalar_lea.vmem %s796_s5, %s516_s7 }
  0x1e   : > { %v585_v11 = vld [vmem:[%s792_s1] sm:$0xff]  ;;  %v269_v13 = vld [vmem:[%s236_s11 + $0x8] sm:$0xff]  ;;  %v595_v18 = vld [vmem:[%s794_s3 + $0x10] sm:$0xff] }
  0x1f   : > { %v268_v12 = vld [vmem:[%s236_s11] sm:$0xff]  ;;  %v598_v15 = vld [vmem:[%s794_s3 + $0x28] sm:$0xff]  ;;  %v596_v17 = vld [vmem:[%s794_s3 + $0x18] sm:$0xff] }
  0x20   : > { %340 = vmatpush.bf16.msra.mxu0 %v591_v3  ;;  %v270_v14 = vpack.c.bf16 %v269_v13, %v268_v12  ;;  %v597_v16 = vld [vmem:[%s794_s3 + $0x20] sm:$0xff]  ;;  %v594_v19 = vld [vmem:[%s794_s3 + $0x8] sm:$0xff] }
  0x21   : > { %428 = vmatpush.bf16.msra.mxu1 %v599_v5  ;;  %v593_v20 = vld [vmem:[%s794_s3] sm:$0xff] }
  0x22   : > { %v625_v22 = vld [vmem:[%s793_s2] ss:$0 sm:$0xff] }
  0x23   : > { %v626_v32 = vld [vmem:[%s795_s4] ss:$0 sm:$0xff] }
  0x24   : > { %341 = vmatpush.bf16.msra.mxu0 %v590_v6 }
  0x25   : > { %429 = vmatpush.bf16.msra.mxu1 %v598_v15 }
  0x28   : > { %342 = vmatpush.bf16.msra.mxu0 %v589_v7 }
  0x29   : > { %430 = vmatpush.bf16.msra.mxu1 %v597_v16 }
  0x2c   : > { %343 = vmatpush.bf16.msra.mxu0 %v588_v8 }
  0x2d   : > { %431 = vmatpush.bf16.msra.mxu1 %v596_v17 }
  0x30   : > { %344 = vmatpush.bf16.msra.mxu0 %v587_v9 }
  0x31   : > { %432 = vmatpush.bf16.msra.mxu1 %v595_v18 }
  0x34   : > { %345 = vmatpush.bf16.msra.mxu0 %v586_v10 }
  0x35   : > { %433 = vmatpush.bf16.msra.mxu1 %v594_v19 }
  0x38   : > { %346 = vmatpush.bf16.msra.mxu0 %v585_v11 }
  0x39   : > { %434 = vmatpush.bf16.msra.mxu1 %v593_v20 }
  0x3b   : > { %347 = vmatmul.bf16.vlgmr.msra.gmra.mxu0 %v270_v14 }
  0xb8   : > { %v348_v21 = vpop.f32.mrf.mxu0 }
  0xb9   : > { %v349_v24 = vadd.f32 %v625_v22, %v348_v21 }
  0xc0   : > { %v350_v23 = vpop.f32.mrf.mxu0 }
  0xc1   : > { %v351_v25 = vadd.f32 %v625_v22, %v350_v23 }
  0xc3   : > { %v353_v26 = vpack.c.bf16 %v351_v25, %v349_v24 }
  0xc5   : > { %v354_v27 = vunpack.c.l.bf16 %v353_v26  ;;  %v355_v28 = vunpack.c.h.bf16 %v353_v26 }
  0xc7   : > { %627 = vtanh.f32 %v354_v27 }
  0xc8   : > { %629 = vtanh.f32 %v355_v28 }
  0xcd   : > { %v628_v29 = vpop.eup %627 }
  0xce   : > { %v630_v30 = vpop.eup %629 }
  0xcf   : > { %v358_v31 = vpack.c.bf16 %v630_v30, %v628_v29 }
  0xd1   : > { %435 = vmatmul.bf16.vlgmr.msra.gmra.mxu1 %v358_v31 }
 0x14e   : > { %v436_v33 = vpop.f32.mrf.mxu1 }
 0x14f   : > { %v437_v34 = vadd.f32 %v626_v32, %v436_v33 }
 0x151   : > { %441 = vst [vmem:[%s266_s18] sm:$0xff] %v437_v34 }
 0x156   : > { %v438_v35 = vpop.f32.mrf.mxu1 }
 0x157   : > { %v439_v36 = vadd.f32 %v626_v32, %v438_v35 }
 0x159   : > { %442 = vst [vmem:[%s266_s18 + $0x8] sm:$0xff] %v439_v36 }
 0x15a PF: > { %p12_p9 = scmp.ge.s32.totalorder %s702_s22, 4   ;;  %s797_s18 = smov %s649_s19 }
 0x15b   : > { %s798_s19 = smov %s711_s25  ;;  %s799_s20 = smov %s702_s22 }
 0x15c   :  { %14 = sbr.rel (!%p12_p9) target bundleno = 2 (0x2), region = 113 }

</bundles_post_ra>
